<compile_context>
chip_gen: v6e
topology: v6e:2x2x1
jax: 0.10.0
libtpu: 0.0.40
codegen_flags: <defaults>
</compile_context>

<pallas_src>
import math
import functools
from typing import NamedTuple

import jax
import jax.numpy as jnp
from jax.experimental import pallas as pl
from jax.experimental.pallas import tpu as pltpu


def _round_up(x, m):
    return (x + m - 1) // m * m


class ThreeHotParams(NamedTuple):
    table: jax.Array     # (pack*Vtot_pad, pack*E) folded (W^T and sqrt(E) included)
    bias: jax.Array      # (1, pack*E) bias * sqrt(E), tiled pack times
    emb_size: int
    vtot_pad: int
    off_v: int           # row offset of the "v" table in the stacked table
    off_f: int           # row offset of the "f" table in the stacked table
    pack: int            # logical rows packed per 128-lane output row


def prepare_three_hot_params(emb_i, emb_v, emb_f, comb_w, comb_b):
    """Fold the combiner Linear (and the sqrt(E) scale) into one gather table.

        out = (concat([E_i[i], E_v[v], E_f[f]]) @ W^T + b) * sqrt(E)
            = onehot(i, Vi+v, Vi+Vv+f) @ (blockdiag(E_*) @ W^T * sqrt(E))
              + b * sqrt(E)

    For emb_size < 128 the folded table is additionally replicated
    block-diagonally pack = 128 // emb_size times so one MXU matmul emits a
    lane-dense (rows/pack, 128) output tile.  Call this once at init time.
    """
    f32 = jnp.float32
    emb_size = emb_i.shape[1]
    scale = math.sqrt(emb_size)
    vi, vv, vf = emb_i.shape[0], emb_v.shape[0], emb_f.shape[0]
    vtot = vi + vv + vf
    vtot_pad = _round_up(vtot, 128)          # lane-dense one-hot, aligned MXU K

    hi = jax.lax.Precision.HIGHEST
    w_t = comb_w.astype(f32).T               # (3E, E)
    folded = jnp.concatenate(
        [jnp.dot(emb_i.astype(f32), w_t[0 * emb_size:1 * emb_size], precision=hi),
         jnp.dot(emb_v.astype(f32), w_t[1 * emb_size:2 * emb_size], precision=hi),
         jnp.dot(emb_f.astype(f32), w_t[2 * emb_size:3 * emb_size], precision=hi)],
        axis=0) * scale                      # (vtot, E)
    folded = jnp.pad(folded, ((0, vtot_pad - vtot), (0, 0)))

    pack = 128 // emb_size if (emb_size < 128 and 128 % emb_size == 0) else 1
    if pack > 1:
        # Block-diagonal replication -> lane-dense (128-wide) output rows.
        table = jnp.kron(jnp.eye(pack, dtype=f32), folded)
    else:
        table = folded

    bias = jnp.tile(comb_b.astype(f32).reshape(1, emb_size) * scale, (1, pack))
    return ThreeHotParams(table, bias, emb_size, vtot_pad, vi, vi + vv, pack)


def _fused_kernel(tok_ref, tbl_ref, b_ref, o_ref, *, pack, vtot_pad, off_v,
                  off_f):
    """One grid step: one-hot gather of the folded table + bias.

    tok_ref : (rp, 3*pack) int32  raw token ids (offsets applied here).
    tbl_ref : (pack*Vtot_pad, pack*E) f32  folded table (grid-invariant).
    b_ref   : (1, pack*E) f32     scaled bias (grid-invariant).
    o_ref   : (rp, pack*E) f32    lane-dense output tile.
    """
    tok = tok_ref[...]                                    # (rp, 3*pack)
    rp = tok.shape[0]
    k_dim = pack * vtot_pad

    # Build the combined one-hot. Logical row (r, g) component c hits lane
    # g*Vtot_pad + base_c + token; all hits are disjoint, so OR-ing is exact.
    lane = jax.lax.broadcasted_iota(jnp.int32, (rp, k_dim), 1)
    hits = None
    for g in range(pack):
        for c, base in enumerate((0, off_v, off_f)):
            tgt = tok[:, 3 * g + c:3 * g + c + 1] + (g * vtot_pad + base)
            h = lane == tgt
            hits = h if hits is None else (hits | h)
    onehot = hits.astype(jnp.float32)

    acc = jnp.dot(onehot, tbl_ref[...],
                  preferred_element_type=jnp.float32)     # (rp, pack*E)
    o_ref[...] = (acc + b_ref[...]).astype(o_ref.dtype)


def three_hot_concat_embedding(tokens, params: ThreeHotParams, *,
                               row_tile=512):
    """tokens: (..., 3) int.  Returns (..., emb_size) float32."""
    assert tokens.ndim > 1 and tokens.shape[-1] == 3, "must be threehot"
    E = params.emb_size
    pack = params.pack
    n_lanes = pack * E

    batch_shape = tokens.shape[:-1]
    n = 1
    for d in batch_shape:
        n *= d

    # row_tile counts *logical* rows; physical (packed) rows/step = rt/pack.
    unit = 8 * pack
    row_tile = max(unit, min(_round_up(row_tile, unit), _round_up(n, unit)))
    n_pad = _round_up(n, row_tile)

    idx = tokens.reshape(n, 3).astype(jnp.int32)
    if n_pad != n:
        # Padded rows hit table row 0 and are sliced away below.
        idx = jnp.pad(idx, ((0, n_pad - n), (0, 0)))
    idx = idx.reshape(n_pad // pack, 3 * pack)

    rp = row_tile // pack                    # physical rows per grid step
    k_dim = pack * params.vtot_pad
    grid = (n_pad // row_tile,)

    # VMEM budget from the actual footprint: double-buffered blocks plus the
    # one-hot intermediate, with headroom; capped so it is safe on all gens.
    def _blk(rows, cols):
        return rows * _round_up(cols, 128) * 4

    need = 2 * (_blk(rp, 3 * pack) + _blk(k_dim, n_lanes) + _blk(8, n_lanes)
                + _blk(rp, n_lanes)) + 2 * rp * k_dim * 4
    vmem_limit = int(max(4 << 20, min(32 << 20, need + (1 << 20))))

    out = pl.pallas_call(
        functools.partial(_fused_kernel, pack=pack, vtot_pad=params.vtot_pad,
                          off_v=params.off_v, off_f=params.off_f),
        out_shape=jax.ShapeDtypeStruct((n_pad // pack, n_lanes), jnp.float32),
        grid_spec=pltpu.PrefetchScalarGridSpec(
            num_scalar_prefetch=0,
            grid=grid,
            in_specs=[
                pl.BlockSpec((rp, 3 * pack), lambda r: (r, 0)),
                pl.BlockSpec((k_dim, n_lanes), lambda r: (0, 0)),   # invariant
                pl.BlockSpec((1, n_lanes), lambda r: (0, 0)),       # invariant
            ],
            out_specs=pl.BlockSpec((rp, n_lanes), lambda r: (r, 0)),
        ),
        compiler_params=pltpu.CompilerParams(
            dimension_semantics=("parallel",),
            vmem_limit_bytes=vmem_limit,
        ),
    )(idx, params.table, params.bias)

    out = out.reshape(n_pad, E)[:n]
    return out.reshape(*batch_shape, E)


def _reference(tokens, emb_i, emb_v, emb_f, comb_w, comb_b):
    emb_size = emb_i.shape[1]
    i = jnp.take(emb_i, tokens[..., 0], axis=0)
    v = jnp.take(emb_v, tokens[..., 1], axis=0)
    f = jnp.take(emb_f, tokens[..., 2], axis=0)
    cat = jnp.concatenate([i, v, f], axis=-1)
    lin = jnp.dot(cat, comb_w.T, precision=jax.lax.Precision.HIGHEST) + comb_b
    return lin * math.sqrt(emb_size)


if __name__ == "__main__":
    # Small, deterministic synthetic setup (mimics ThreeHotDict sizes).
    batch, seq = 2, 8
    emb_size = 32
    size_i, size_v, size_f = 20, 22, 28
    pad_i, pad_v, pad_f = 0, 0, 0

    key = jax.random.PRNGKey(0)
    k_i, k_v, k_f, k_w, k_b, k_tok = jax.random.split(key, 6)

    emb_i = jax.random.normal(k_i, (size_i, emb_size), jnp.float32) * 0.02
    emb_v = jax.random.normal(k_v, (size_v, emb_size), jnp.float32) * 0.02
    emb_f = jax.random.normal(k_f, (size_f, emb_size), jnp.float32) * 0.02
    # padding_idx rows are zero (as nn.Embedding initializes them).
    emb_i = emb_i.at[pad_i].set(0.0)
    emb_v = emb_v.at[pad_v].set(0.0)
    emb_f = emb_f.at[pad_f].set(0.0)

    # nn.Linear(3*emb_size, emb_size): weight (out=E, in=3E), bias (E,)
    comb_w = jax.random.normal(k_w, (emb_size, 3 * emb_size),
                               jnp.float32) * 0.05
    comb_b = jax.random.normal(k_b, (emb_size,), jnp.float32) * 0.01

    tokens = jnp.stack(
        [
            jax.random.randint(jax.random.fold_in(k_tok, 0), (batch, seq), 0,
                               size_i),
            jax.random.randint(jax.random.fold_in(k_tok, 1), (batch, seq), 0,
                               size_v),
            jax.random.randint(jax.random.fold_in(k_tok, 2), (batch, seq), 0,
                               size_f),
        ],
        axis=-1,
    ).astype(jnp.int32)                       # (batch, seq, 3)

    # Table fold happens once, at "parameter init" time.
    params = prepare_three_hot_params(emb_i, emb_v, emb_f, comb_w, comb_b)

    out = three_hot_concat_embedding(tokens, params)
    out = jax.block_until_ready(out)

    ref = _reference(tokens, emb_i, emb_v, emb_f, comb_w, comb_b)
    assert out.shape == (batch, seq, emb_size)
    assert jnp.allclose(out, ref, atol=1e-4, rtol=1e-4), float(
        jnp.max(jnp.abs(out - ref)))
    print("KERNEL_OK")
</pallas_src>

<mosaic_0001>
module attributes {stable_mosaic.version = 11 : i64} {
  func.func @_fused_kernel(%arg0: i32, %arg1: memref<8x12xi32, #tpu.memory_space<vmem>>, %arg2: memref<512x128xf32, #tpu.memory_space<vmem>>, %arg3: memref<1x128xf32, #tpu.memory_space<vmem>>, %arg4: memref<8x128xf32, #tpu.memory_space<vmem>>) attributes {dimension_semantics = [#tpu.dimension_semantics<parallel>], iteration_bounds = array<i64: 1>, scalar_prefetch = 0 : i64, scratch_operands = 0 : i64, tpu.core_type = #tpu.core_type<tc>, window_params = [{transform_indices = @transform_0, window_bounds = array<i64: 8, 12>}, {pipeline_mode = #tpu.pipeline_mode<synchronous>, transform_indices = @transform_1, window_bounds = array<i64: 512, 128>}, {pipeline_mode = #tpu.pipeline_mode<synchronous>, transform_indices = @transform_2, window_bounds = array<i64: 1, 128>}, {transform_indices = @transform_3, window_bounds = array<i64: 8, 128>}]} {
    %c0 = arith.constant 0 : index
    %c0_0 = arith.constant 0 : index
    %0 = vector.load %arg1[%c0, %c0_0] : memref<8x12xi32, #tpu.memory_space<vmem>>, vector<8x12xi32>
    %1 = tpu.iota {dimensions = array<i32: 1>} : vector<8x512xi32>
    %2 = vector.extract_strided_slice %0 {offsets = [0, 0], sizes = [8, 1], strides = [1, 1]} : vector<8x12xi32> to vector<8x1xi32>
    %c0_i32 = arith.constant 0 : i32
    %3 = vector.broadcast %c0_i32 : i32 to vector<8x1xi32>
    %4 = arith.addi %2, %3 : vector<8x1xi32>
    %5 = vector.broadcast %4 : vector<8x1xi32> to vector<8x512xi32>
    %6 = arith.cmpi eq, %1, %5 : vector<8x512xi32>
    %7 = vector.extract_strided_slice %0 {offsets = [0, 1], sizes = [8, 1], strides = [1, 1]} : vector<8x12xi32> to vector<8x1xi32>
    %c20_i32 = arith.constant 20 : i32
    %8 = vector.broadcast %c20_i32 : i32 to vector<8x1xi32>
    %9 = arith.addi %7, %8 : vector<8x1xi32>
    %10 = vector.broadcast %9 : vector<8x1xi32> to vector<8x512xi32>
    %11 = arith.cmpi eq, %1, %10 : vector<8x512xi32>
    %12 = arith.ori %6, %11 : vector<8x512xi1>
    %13 = vector.extract_strided_slice %0 {offsets = [0, 2], sizes = [8, 1], strides = [1, 1]} : vector<8x12xi32> to vector<8x1xi32>
    %c42_i32 = arith.constant 42 : i32
    %14 = vector.broadcast %c42_i32 : i32 to vector<8x1xi32>
    %15 = arith.addi %13, %14 : vector<8x1xi32>
    %16 = vector.broadcast %15 : vector<8x1xi32> to vector<8x512xi32>
    %17 = arith.cmpi eq, %1, %16 : vector<8x512xi32>
    %18 = arith.ori %12, %17 : vector<8x512xi1>
    %19 = vector.extract_strided_slice %0 {offsets = [0, 3], sizes = [8, 1], strides = [1, 1]} : vector<8x12xi32> to vector<8x1xi32>
    %c128_i32 = arith.constant 128 : i32
    %20 = vector.broadcast %c128_i32 : i32 to vector<8x1xi32>
    %21 = arith.addi %19, %20 : vector<8x1xi32>
    %22 = vector.broadcast %21 : vector<8x1xi32> to vector<8x512xi32>
    %23 = arith.cmpi eq, %1, %22 : vector<8x512xi32>
    %24 = arith.ori %18, %23 : vector<8x512xi1>
    %25 = vector.extract_strided_slice %0 {offsets = [0, 4], sizes = [8, 1], strides = [1, 1]} : vector<8x12xi32> to vector<8x1xi32>
    %c148_i32 = arith.constant 148 : i32
    %26 = vector.broadcast %c148_i32 : i32 to vector<8x1xi32>
    %27 = arith.addi %25, %26 : vector<8x1xi32>
    %28 = vector.broadcast %27 : vector<8x1xi32> to vector<8x512xi32>
    %29 = arith.cmpi eq, %1, %28 : vector<8x512xi32>
    %30 = arith.ori %24, %29 : vector<8x512xi1>
    %31 = vector.extract_strided_slice %0 {offsets = [0, 5], sizes = [8, 1], strides = [1, 1]} : vector<8x12xi32> to vector<8x1xi32>
    %c170_i32 = arith.constant 170 : i32
    %32 = vector.broadcast %c170_i32 : i32 to vector<8x1xi32>
    %33 = arith.addi %31, %32 : vector<8x1xi32>
    %34 = vector.broadcast %33 : vector<8x1xi32> to vector<8x512xi32>
    %35 = arith.cmpi eq, %1, %34 : vector<8x512xi32>
    %36 = arith.ori %30, %35 : vector<8x512xi1>
    %37 = vector.extract_strided_slice %0 {offsets = [0, 6], sizes = [8, 1], strides = [1, 1]} : vector<8x12xi32> to vector<8x1xi32>
    %c256_i32 = arith.constant 256 : i32
    %38 = vector.broadcast %c256_i32 : i32 to vector<8x1xi32>
    %39 = arith.addi %37, %38 : vector<8x1xi32>
    %40 = vector.broadcast %39 : vector<8x1xi32> to vector<8x512xi32>
    %41 = arith.cmpi eq, %1, %40 : vector<8x512xi32>
    %42 = arith.ori %36, %41 : vector<8x512xi1>
    %43 = vector.extract_strided_slice %0 {offsets = [0, 7], sizes = [8, 1], strides = [1, 1]} : vector<8x12xi32> to vector<8x1xi32>
    %c276_i32 = arith.constant 276 : i32
    %44 = vector.broadcast %c276_i32 : i32 to vector<8x1xi32>
    %45 = arith.addi %43, %44 : vector<8x1xi32>
    %46 = vector.broadcast %45 : vector<8x1xi32> to vector<8x512xi32>
    %47 = arith.cmpi eq, %1, %46 : vector<8x512xi32>
    %48 = arith.ori %42, %47 : vector<8x512xi1>
    %49 = vector.extract_strided_slice %0 {offsets = [0, 8], sizes = [8, 1], strides = [1, 1]} : vector<8x12xi32> to vector<8x1xi32>
    %c298_i32 = arith.constant 298 : i32
    %50 = vector.broadcast %c298_i32 : i32 to vector<8x1xi32>
    %51 = arith.addi %49, %50 : vector<8x1xi32>
    %52 = vector.broadcast %51 : vector<8x1xi32> to vector<8x512xi32>
    %53 = arith.cmpi eq, %1, %52 : vector<8x512xi32>
    %54 = arith.ori %48, %53 : vector<8x512xi1>
    %55 = vector.extract_strided_slice %0 {offsets = [0, 9], sizes = [8, 1], strides = [1, 1]} : vector<8x12xi32> to vector<8x1xi32>
    %c384_i32 = arith.constant 384 : i32
    %56 = vector.broadcast %c384_i32 : i32 to vector<8x1xi32>
    %57 = arith.addi %55, %56 : vector<8x1xi32>
    %58 = vector.broadcast %57 : vector<8x1xi32> to vector<8x512xi32>
    %59 = arith.cmpi eq, %1, %58 : vector<8x512xi32>
    %60 = arith.ori %54, %59 : vector<8x512xi1>
    %61 = vector.extract_strided_slice %0 {offsets = [0, 10], sizes = [8, 1], strides = [1, 1]} : vector<8x12xi32> to vector<8x1xi32>
    %c404_i32 = arith.constant 404 : i32
    %62 = vector.broadcast %c404_i32 : i32 to vector<8x1xi32>
    %63 = arith.addi %61, %62 : vector<8x1xi32>
    %64 = vector.broadcast %63 : vector<8x1xi32> to vector<8x512xi32>
    %65 = arith.cmpi eq, %1, %64 : vector<8x512xi32>
    %66 = arith.ori %60, %65 : vector<8x512xi1>
    %67 = vector.extract_strided_slice %0 {offsets = [0, 11], sizes = [8, 1], strides = [1, 1]} : vector<8x12xi32> to vector<8x1xi32>
    %c426_i32 = arith.constant 426 : i32
    %68 = vector.broadcast %c426_i32 : i32 to vector<8x1xi32>
    %69 = arith.addi %67, %68 : vector<8x1xi32>
    %70 = vector.broadcast %69 : vector<8x1xi32> to vector<8x512xi32>
    %71 = arith.cmpi eq, %1, %70 : vector<8x512xi32>
    %72 = arith.ori %66, %71 : vector<8x512xi1>
    %73 = arith.extui %72 : vector<8x512xi1> to vector<8x512xi32>
    %74 = arith.sitofp %73 : vector<8x512xi32> to vector<8x512xf32>
    %c0_1 = arith.constant 0 : index
    %c0_2 = arith.constant 0 : index
    %75 = vector.load %arg2[%c0_1, %c0_2] : memref<512x128xf32, #tpu.memory_space<vmem>>, vector<512x128xf32>
    %cst = arith.constant dense<0.000000e+00> : vector<8x128xf32>
    %76 = tpu.matmul %74, %75, %cst {dimension_numbers = #tpu.dot_dimension_numbers<[1], [0], [0], [1], [0, 0, 1, 1], [], []>} : vector<8x512xf32>, vector<512x128xf32>, vector<8x128xf32> -> vector<8x128xf32>
    %c0_3 = arith.constant 0 : index
    %c0_4 = arith.constant 0 : index
    %77 = vector.load %arg3[%c0_3, %c0_4] : memref<1x128xf32, #tpu.memory_space<vmem>>, vector<1x128xf32>
    %78 = vector.broadcast %77 : vector<1x128xf32> to vector<8x128xf32>
    %79 = arith.addf %76, %78 : vector<8x128xf32>
    %c0_5 = arith.constant 0 : index
    %c0_6 = arith.constant 0 : index
    %80 = vector.load %arg4[%c0_5, %c0_6] : memref<8x128xf32, #tpu.memory_space<vmem>>, vector<8x128xf32>
    tpu.vector_store %arg4[%c0_5, %c0_6], %79 {strides = array<i32>} : memref<8x128xf32, #tpu.memory_space<vmem>>, vector<8x128xf32>,
    return
  }
  func.func @transform_0(%arg0: i32) -> (i32, i32) {
    %c0_i32 = arith.constant 0 : i32
    %c0_i32_0 = arith.constant 0 : i32
    return %arg0, %c0_i32 : i32, i32
  }
  func.func @transform_1(%arg0: i32) -> (i32, i32) {
    %c0_i32 = arith.constant 0 : i32
    %c0_i32_0 = arith.constant 0 : i32
    %c0_i32_1 = arith.constant 0 : i32
    return %c0_i32, %c0_i32_0 : i32, i32
  }
  func.func @transform_2(%arg0: i32) -> (i32, i32) {
    %c0_i32 = arith.constant 0 : i32
    %c0_i32_0 = arith.constant 0 : i32
    %c0_i32_1 = arith.constant 0 : i32
    return %c0_i32, %c0_i32_0 : i32, i32
  }
  func.func @transform_3(%arg0: i32) -> (i32, i32) {
    %c0_i32 = arith.constant 0 : i32
    %c0_i32_0 = arith.constant 0 : i32
    return %arg0, %c0_i32 : i32, i32
  }
}

</mosaic_0001>

<bundles_post_ra>
// kernel: tpu_custom_call.1
= control target key start
LH: loop header
LB: loop body
LE: loop exit
PB: predicated region body
PF: predicated region fallthrough
CT: control target
= control target key end

     0   :  { %8 = vsyncpa [#allocation3], 0  ;;  %s752_s0 = inlined_call_operand.hbm [shape: s32[8,12], index: 0, kind: input, shape index: {}]   ;;  %s753_s1 = inlined_call_operand.hbm [shape: f32[512,128], index: 1, kind: input, shape index: {}]   ;;  %s754_s2 = inlined_call_operand.vmem [shape: f32[1,128], index: 2, kind: input, shape index: {}]   ;;  %s755_s3 = inlined_call_operand.hbm [shape: f32[8,128], index: 3, kind: output, shape index: {}]  }
   0x1   :  { %9 = vsyncpa [#allocation6], 0 }
   0x2   :  { %10 = vsyncpa [#allocation4], 0  ;;  %s593_s12 = smov [#allocation2]   ;;  %s594_s14 = smov [#allocation5]  }
   0x3   :  { %s17_s13 = sshll.u32 %s593_s12, 4  ;;  %s26_s15 = sshll.u32 %s594_s14, 4  ;;  %s18_s13 = int_to_ptr.vmem [resolvable:$true] %s17_s13  ;;  %s27_s15 = int_to_ptr.vmem [resolvable:$true] %s26_s15 }
   0x4   :  { %s535_s16 = scalar_lea.vmem %s18_s13, 128  ;;  %p540_p1 = scmp.lt.s32.totalorder %s18_s13, %s18_s13 }
   0x5   :  { %p536_p0 = scmp.ne.s32.totalorder %s18_s13, %s535_s16  ;;  %p541_p2 = scmp.lt.s32.totalorder %s535_s16, %s535_s16 }
   0x7   :  { %p542_p3 = por %p541_p2, %p540_p1 }
   0x9   :  { %p543_p4 = pnand %p542_p3, %p536_p0 }
   0xb   :  { %546 = shalt.err (!%p543_p4)
}
   0xc   :  { %20 = dma.hbm_to_vmem [thread:$0]  %s752_s0, 128, %s18_s13, [#allocation3]  }
   0xd   :  { %s555_s19 = scalar_lea.vmem %s27_s15, 8192  ;;  %p560_p6 = scmp.lt.s32.totalorder %s27_s15, %s27_s15 }
   0xe   :  { %p556_p5 = scmp.ne.s32.totalorder %s27_s15, %s555_s19  ;;  %p561_p7 = scmp.lt.s32.totalorder %s555_s19, %s555_s19 }
  0x10   :  { %p562_p8 = por %p561_p7, %p560_p6 }
  0x12   :  { %p563_p9 = pnand %p562_p8, %p556_p5 }
  0x14   :  { %566 = shalt.err (!%p563_p9)
}
  0x15   :  { %s595_s20 = smov 128   ;;  %s596_s21 = smov 8  }
  0x16   :  { %32 = dma.hbm_to_vmem [thread:$0]  %s753_s1, 8192, %s27_s15, [#allocation6], %s595_s20, %s595_s20, %s596_s21  }
  0x17   :  { %587 = dma.done.wait [#allocation3], 128  }
  0x18   :  { %588 = vsyncadd [#allocation3], 4294967168 }
  0x19   :  { %589 = dma.done.wait [#allocation6], 8192  }
  0x1a   :  { %590 = vsyncadd [#allocation6], 4294959104  ;;  %v597_v0 = vmov 0   ;;  %v598_v1 = vmov 2   ;;  %v637_v2 = vld [vmem:[#allocation2] sm:$0xff]  ;;  %v599_v8 = vmov 1  }
  0x1b   :  { %515 = vset.pattern.permute.xlu0 %v597_v0  ;;  %517 = vset.pattern.permute.xlu1 %v598_v1  ;;  %v66_v3 = vadd.s32 42, %v637_v2  ;;  %v54_v4 = vadd.s32 20, %v637_v2  ;;  %v78_v5 = vadd.s32 128, %v637_v2  ;;  %v225_v6 = vld [vmem:[#allocation5 + $0xf8] sm:$0xff]  ;;  %v600_v11 = vmov 3   ;;  %v224_v17 = vld [vmem:[#allocation5 + $0xf0] sm:$0xff] }
  0x1c   :  { %48 = vperm.xlu0 %515, %v637_v2   ;;  %v257_v7 = vld [vmem:[#allocation5 + $0x1f8] sm:$0xff]  ;;  %427 = vmatprep.subr.mxu0 %v225_v6  ;;  %v102_v12 = vadd.s32 170, %v637_v2  ;;  %v90_v13 = vadd.s32 148, %v637_v2  ;;  %v601_v14 = vmov 5   ;;  %v602_v15 = vmov 4   ;;  %v256_v18 = vld [vmem:[#allocation5 + $0x1f0] sm:$0xff] }
  0x1d   :  { %68 = vperm.xlu1 %517, %v66_v3   ;;  %v209_v9 = vld [vmem:[#allocation5 + $0x78] sm:$0xff]  ;;  %462 = vmatprep.subr.mxu1 %v257_v7  ;;  %v138_v16 = vadd.s32 298, %v637_v2  ;;  %v208_v19 = vld [vmem:[#allocation5 + $0x70] sm:$0xff]  ;;  %v114_v21 = vadd.s32 256, %v637_v2  ;;  %v223_v22 = vld [vmem:[#allocation5 + $0xe8] sm:$0xff]  ;;  %v603_v24 = vmov 8  }
  0x1e   :  { %v241_v10 = vld [vmem:[#allocation5 + $0x178] sm:$0xff]  ;;  %428 = vmatpush3.msra.mxu0 %v209_v9  ;;  %v240_v20 = vld [vmem:[#allocation5 + $0x170] sm:$0xff]  ;;  %v255_v23 = vld [vmem:[#allocation5 + $0x1e8] sm:$0xff]  ;;  %v604_v28 = vmov 6   ;;  %v174_v29 = vadd.s32 426, %v637_v2  ;;  %v126_v32 = vadd.s32 276, %v637_v2 }
  0x1f   :  { %463 = vmatpush3.msra.mxu1 %v241_v10  ;;  %429 = vmatprep.subr.mxu0 %v224_v17  ;;  %v207_v25 = vld [vmem:[#allocation5 + $0x68] sm:$0xff]  ;;  %v222_v27 = vld [vmem:[#allocation5 + $0xe0] sm:$0xff]  ;;  %v605_v34 = vmov 11   ;;  %v221_v35 = vld [vmem:[#allocation5 + $0xd8] sm:$0xff]  ;;  %v606_v38 = vmov 7   ;;  %v150_v43 = vadd.s32 384, %v637_v2 }
  0x20   :  { %516 = vset.pattern.permute.xlu0 %v599_v8  ;;  %464 = vmatprep.subr.mxu1 %v256_v18  ;;  %v239_v26 = vld [vmem:[#allocation5 + $0x168] sm:$0xff]  ;;  %v254_v30 = vld [vmem:[#allocation5 + $0x1e0] sm:$0xff]  ;;  %v253_v36 = vld [vmem:[#allocation5 + $0x1d8] sm:$0xff]  ;;  %v607_v48 = vmov 9   ;;  %v162_v53 = vadd.s32 404, %v637_v2  ;;  %v608_v58 = vmov 10  }
  0x21   :  { %56 = vperm.xlu0 %516, %v54_v4   ;;  %518 = vset.pattern.permute.xlu1 %v600_v11  ;;  %v206_v31 = vld [vmem:[#allocation5 + $0x60] sm:$0xff]  ;;  %v205_v37 = vld [vmem:[#allocation5 + $0x58] sm:$0xff]  ;;  %v220_v40 = vld [vmem:[#allocation5 + $0xd0] sm:$0xff]  ;;  %s610_s24 = smov [#allocation7]  }
  0x22   :  { %80 = vperm.xlu1 %518, %v78_v5   ;;  %430 = vmatpush3.msra.mxu0 %v208_v19  ;;  %v238_v33 = vld [vmem:[#allocation5 + $0x160] sm:$0xff]  ;;  %v237_v39 = vld [vmem:[#allocation5 + $0x158] sm:$0xff]  ;;  %v252_v41 = vld [vmem:[#allocation5 + $0x1d0] sm:$0xff]  ;;  %s412_s25 = sshll.u32 %s610_s24, 4  ;;  %s413_s25 = int_to_ptr.vmem [resolvable:$true] %s412_s25 }
  0x23   :  { %465 = vmatpush3.msra.mxu1 %v240_v20  ;;  %431 = vmatprep.subr.mxu0 %v223_v22  ;;  %v204_v42 = vld [vmem:[#allocation5 + $0x50] sm:$0xff]  ;;  %v219_v45 = vld [vmem:[#allocation5 + $0xc8] sm:$0xff]  ;;  %v218_v50 = vld [vmem:[#allocation5 + $0xc0] sm:$0xff]  ;;  %s567_s26 = scalar_lea.vmem %s413_s25, 128  ;;  %p572_p11 = scmp.lt.s32.totalorder %s413_s25, %s413_s25 }
  0x24   :  { %466 = vmatprep.subr.mxu1 %v255_v23  ;;  %432 = vmatpush3.msra.mxu0 %v207_v25  ;;  %v236_v44 = vld [vmem:[#allocation5 + $0x150] sm:$0xff]  ;;  %v251_v46 = vld [vmem:[#allocation5 + $0x1c8] sm:$0xff]  ;;  %v250_v51 = vld [vmem:[#allocation5 + $0x1c0] sm:$0xff]  ;;  %p568_p10 = scmp.ne.s32.totalorder %s413_s25, %s567_s26  ;;  %p573_p12 = scmp.lt.s32.totalorder %s567_s26, %s567_s26 }
  0x25   :  { %520 = vset.pattern.permute.xlu0 %v601_v14  ;;  %467 = vmatpush3.msra.mxu1 %v239_v26  ;;  %v203_v47 = vld [vmem:[#allocation5 + $0x48] sm:$0xff]  ;;  %v202_v52 = vld [vmem:[#allocation5 + $0x40] sm:$0xff]  ;;  %v217_v55 = vld [vmem:[#allocation5 + $0xb8] sm:$0xff] }
  0x26   :  { %104 = vperm.xlu0 %520, %v102_v12   ;;  %519 = vset.pattern.permute.xlu1 %v602_v15  ;;  %v235_v49 = vld [vmem:[#allocation5 + $0x148] sm:$0xff]  ;;  %v234_v54 = vld [vmem:[#allocation5 + $0x140] sm:$0xff]  ;;  %v249_v56 = vld [vmem:[#allocation5 + $0x1b8] sm:$0xff]  ;;  %p574_p13 = por %p573_p12, %p572_p11 }
  0x27   :  { %92 = vperm.xlu1 %519, %v90_v13   ;;  %433 = vmatprep.subr.mxu0 %v222_v27  ;;  %v201_v57 = vld [vmem:[#allocation5 + $0x38] sm:$0xff]  ;;  %v216_v60 = vld [vmem:[#allocation5 + $0xb0] sm:$0xff]  ;;  %v215_v0 = vld [vmem:[#allocation5 + $0xa8] sm:$0xff] }
  0x28   :  { %468 = vmatprep.subr.mxu1 %v254_v30  ;;  %434 = vmatpush3.msra.mxu0 %v206_v31  ;;  %v233_v59 = vld [vmem:[#allocation5 + $0x138] sm:$0xff]  ;;  %v248_v61 = vld [vmem:[#allocation5 + $0x1b0] sm:$0xff]  ;;  %v247_v1 = vld [vmem:[#allocation5 + $0x1a8] sm:$0xff]  ;;  %p575_p0 = pnand %p574_p13, %p568_p10 }
  0x29   :  { %469 = vmatpush3.msra.mxu1 %v238_v33  ;;  %435 = vmatprep.subr.mxu0 %v221_v35  ;;  %v200_v62 = vld [vmem:[#allocation5 + $0x30] sm:$0xff]  ;;  %v199_v2 = vld [vmem:[#allocation5 + $0x28] sm:$0xff]  ;;  %v214_v4 = vld [vmem:[#allocation5 + $0xa0] sm:$0xff] }
  0x2a   :  { %523 = vset.pattern.permute.xlu0 %v603_v24  ;;  %470 = vmatprep.subr.mxu1 %v253_v36  ;;  %v232_v63 = vld [vmem:[#allocation5 + $0x130] sm:$0xff]  ;;  %v231_v3 = vld [vmem:[#allocation5 + $0x128] sm:$0xff]  ;;  %v246_v5 = vld [vmem:[#allocation5 + $0x1a0] sm:$0xff]  ;;  %v42_v24 = vlaneseq }
  0x2b   :  { %140 = vperm.xlu0 %523, %v138_v16   ;;  %521 = vset.pattern.permute.xlu1 %v604_v28  ;;  %v198_v6 = vld [vmem:[#allocation5 + $0x20] sm:$0xff]  ;;  %v213_v8 = vld [vmem:[#allocation5 + $0x98] sm:$0xff]  ;;  %v212_v12 = vld [vmem:[#allocation5 + $0x90] sm:$0xff] }
  0x2c   :  { %116 = vperm.xlu1 %521, %v114_v21   ;;  %436 = vmatpush3.msra.mxu0 %v205_v37  ;;  %v230_v7 = vld [vmem:[#allocation5 + $0x120] sm:$0xff]  ;;  %v245_v9 = vld [vmem:[#allocation5 + $0x198] sm:$0xff]  ;;  %v244_v13 = vld [vmem:[#allocation5 + $0x190] sm:$0xff]  ;;  %v651_v26 = vand.u32 127, %v42_v24 }
  0x2d   :  { %471 = vmatpush3.msra.mxu1 %v237_v39  ;;  %437 = vmatprep.subr.mxu0 %v220_v40  ;;  %v197_v10 = vld [vmem:[#allocation5 + $0x18] sm:$0xff]  ;;  %v196_v14 = vld [vmem:[#allocation5 + $0x10] sm:$0xff]  ;;  %v211_v16 = vld [vmem:[#allocation5 + $0x88] sm:$0xff]  ;;  %v758_v39 = vmov 0 }
  0x2e   :  { %472 = vmatprep.subr.mxu1 %v252_v41  ;;  %438 = vmatpush3.msra.mxu0 %v204_v42  ;;  %v229_v11 = vld [vmem:[#allocation5 + $0x118] sm:$0xff]  ;;  %v228_v15 = vld [vmem:[#allocation5 + $0x110] sm:$0xff]  ;;  %v243_v17 = vld [vmem:[#allocation5 + $0x188] sm:$0xff]  ;;  %v657_v30 = vadd.s32 256, %v651_v26  ;;  %v760_v41 = vmov 0 }
  0x2f   :  { %526 = vset.pattern.permute.xlu0 %v605_v34  ;;  %473 = vmatpush3.msra.mxu1 %v236_v44  ;;  %v195_v18 = vld [vmem:[#allocation5 + $0x8] sm:$0xff]  ;;  %v210_v20 = vld [vmem:[#allocation5 + $0x80] sm:$0xff] }
  0x30   :  { %176 = vperm.xlu0 %526, %v174_v29   ;;  %522 = vset.pattern.permute.xlu1 %v606_v38  ;;  %v227_v19 = vld [vmem:[#allocation5 + $0x108] sm:$0xff]  ;;  %v242_v21 = vld [vmem:[#allocation5 + $0x180] sm:$0xff]  ;;  %v654_v29 = vadd.s32 128, %v651_v26  ;;  %v756_v38 = vmov 0 }
  0x31   :  { %128 = vperm.xlu1 %522, %v126_v32   ;;  %439 = vmatprep.subr.mxu0 %v219_v45  ;;  %v194_v22 = vld [vmem:[#allocation5] sm:$0xff]  ;;  %v662_v32 = vadd.s32 384, %v651_v26  ;;  %v609_v45 = vmov 0.0  }
  0x32   :  { %474 = vmatprep.subr.mxu1 %v251_v46  ;;  %440 = vmatpush3.msra.mxu0 %v203_v47  ;;  %v226_v23 = vld [vmem:[#allocation5 + $0x100] sm:$0xff]  ;;  %v767_v47 = vmov 0 }
  0x33   :  { %475 = vmatpush3.msra.mxu1 %v235_v49  ;;  %441 = vmatprep.subr.mxu0 %v218_v50 }
  0x34   :  { %476 = vmatprep.subr.mxu1 %v250_v51  ;;  %442 = vmatpush3.msra.mxu0 %v202_v52 }
  0x35   :  { %524 = vset.pattern.permute.xlu1 %v607_v48  ;;  %477 = vmatpush3.msra.mxu1 %v234_v54 }
  0x36   :  { %152 = vperm.xlu1 %524, %v150_v43   ;;  %443 = vmatprep.subr.mxu0 %v217_v55  ;;  %v763_v43 = vmov 0 }
  0x37   :  { %478 = vmatprep.subr.mxu1 %v249_v56  ;;  %444 = vmatpush3.msra.mxu0 %v201_v57 }
  0x38   :  { %479 = vmatpush3.msra.mxu1 %v233_v59  ;;  %445 = vmatprep.subr.mxu0 %v216_v60 }
  0x39   :  { %480 = vmatprep.subr.mxu1 %v248_v61  ;;  %446 = vmatpush3.msra.mxu0 %v200_v62 }
  0x3a   :  { %525 = vset.pattern.permute.xlu1 %v608_v58  ;;  %481 = vmatpush3.msra.mxu1 %v232_v63 }
  0x3b   :  { %164 = vperm.xlu1 %525, %v162_v53   ;;  %447 = vmatprep.subr.mxu0 %v215_v0  ;;  %v426_v53 = vld [vmem:[%s754_s2] ss:$0 sm:$0xff] }
  0x3c   :  { %482 = vmatprep.subr.mxu1 %v247_v1  ;;  %448 = vmatpush3.msra.mxu0 %v199_v2 }
  0x3d   :  { %483 = vmatpush3.msra.mxu1 %v231_v3  ;;  %449 = vmatprep.subr.mxu0 %v214_v4 }
  0x3e   :  { %484 = vmatprep.subr.mxu1 %v246_v5  ;;  %450 = vmatpush3.msra.mxu0 %v198_v6 }
  0x3f   :  { %485 = vmatpush3.msra.mxu1 %v230_v7  ;;  %451 = vmatprep.subr.mxu0 %v213_v8 }
  0x40   :  { %486 = vmatprep.subr.mxu1 %v245_v9  ;;  %452 = vmatpush3.msra.mxu0 %v197_v10 }
  0x41   :  { %487 = vmatpush3.msra.mxu1 %v229_v11  ;;  %453 = vmatprep.subr.mxu0 %v212_v12 }
  0x42   :  { %488 = vmatprep.subr.mxu1 %v244_v13  ;;  %454 = vmatpush3.msra.mxu0 %v196_v14 }
  0x43   :  { %489 = vmatpush3.msra.mxu1 %v228_v15  ;;  %455 = vmatprep.subr.mxu0 %v211_v16 }
  0x44   :  { %490 = vmatprep.subr.mxu1 %v243_v17  ;;  %456 = vmatpush3.msra.mxu0 %v195_v18 }
  0x45   :  { %491 = vmatpush3.msra.mxu1 %v227_v19  ;;  %457 = vmatprep.subr.mxu0 %v210_v20 }
  0x46   :  { %492 = vmatprep.subr.mxu1 %v242_v21  ;;  %458 = vmatpush3.msra.mxu0 %v194_v22 }
  0x47   :  { %493 = vmatpush3.msra.mxu1 %v226_v23 }
  0x97   :  { %v49_v25 = vpop.permute.xlu0 %48 }
  0x98   :  { %v69_v27 = vpop.permute.xlu1 %68  ;;  %vm50_vm0 = vcmp.eq.s32.totalorder %v651_v26, %v49_v25  ;;  %vm51_vm2 = vcmp.eq.s32.totalorder %v654_v29, %v49_v25  ;;  %vm52_vm4 = vcmp.eq.s32.totalorder %v657_v30, %v49_v25  ;;  %vm53_vm6 = vcmp.eq.s32.totalorder %v662_v32, %v49_v25 }
  0x99   :  { %vm70_vm11 = vcmp.eq.s32.totalorder %v651_v26, %v69_v27  ;;  %vm71_vm13 = vcmp.eq.s32.totalorder %v654_v29, %v69_v27  ;;  %vm72_vm15 = vcmp.eq.s32.totalorder %v657_v30, %v69_v27 }
  0x9c   :  { %v57_v28 = vpop.permute.xlu0 %56 }
  0x9d   :  { %vm58_vm1 = vcmp.eq.s32.totalorder %v651_v26, %v57_v28  ;;  %v81_v31 = vpop.permute.xlu1 %80  ;;  %vm59_vm3 = vcmp.eq.s32.totalorder %v654_v29, %v57_v28  ;;  %vm60_vm5 = vcmp.eq.s32.totalorder %v657_v30, %v57_v28  ;;  %vm61_vm7 = vcmp.eq.s32.totalorder %v662_v32, %v57_v28 }
  0x9e   :  { %vm62_vm8 = vmor %vm50_vm0, %vm58_vm1  ;;  %vm82_vm1 = vcmp.eq.s32.totalorder %v651_v26, %v81_v31 }
  0x9f   :  { %vm63_vm9 = vmor %vm51_vm2, %vm59_vm3  ;;  %vm73_vm2 = vcmp.eq.s32.totalorder %v662_v32, %v69_v27 }
  0xa0   :  { %vm64_vm10 = vmor %vm52_vm4, %vm60_vm5  ;;  %vm83_vm4 = vcmp.eq.s32.totalorder %v654_v29, %v81_v31 }
  0xa1   :  { %vm65_vm12 = vmor %vm53_vm6, %vm61_vm7  ;;  %vm84_vm6 = vcmp.eq.s32.totalorder %v657_v30, %v81_v31  ;;  %vm85_vm7 = vcmp.eq.s32.totalorder %v662_v32, %v81_v31  ;;  %v105_v35 = vpop.permute.xlu0 %104 }
  0xa2   :  { %v93_v33 = vpop.permute.xlu1 %92  ;;  %vm74_vm14 = vmor %vm62_vm8, %vm70_vm11 }
  0xa3   :  { %vm75_vm0 = vmor %vm63_vm9, %vm71_vm13  ;;  %vm94_vm9 = vcmp.eq.s32.totalorder %v651_v26, %v93_v33 }
  0xa4   :  { %vm76_vm3 = vmor %vm64_vm10, %vm72_vm15  ;;  %vm95_vm10 = vcmp.eq.s32.totalorder %v654_v29, %v93_v33 }
  0xa5   :  { %vm77_vm5 = vmor %vm65_vm12, %vm73_vm2  ;;  %vm96_vm2 = vcmp.eq.s32.totalorder %v657_v30, %v93_v33  ;;  %vm97_vm12 = vcmp.eq.s32.totalorder %v662_v32, %v93_v33 }
  0xa6   :  { %vm86_vm8 = vmor %vm74_vm14, %vm82_vm1  ;;  %v141_v37 = vpop.permute.xlu0 %140 }
  0xa7   :  { %v117_v34 = vpop.permute.xlu1 %116  ;;  %vm87_vm11 = vmor %vm75_vm0, %vm83_vm4  ;;  %vm106_vm0 = vcmp.eq.s32.totalorder %v651_v26, %v105_v35 }
  0xa8   :  { %vm88_vm13 = vmor %vm76_vm3, %vm84_vm6  ;;  %vm107_vm3 = vcmp.eq.s32.totalorder %v654_v29, %v105_v35 }
  0xa9   :  { %vm89_vm15 = vmor %vm77_vm5, %vm85_vm7  ;;  %vm108_vm5 = vcmp.eq.s32.totalorder %v657_v30, %v105_v35  ;;  %vm119_vm7 = vcmp.eq.s32.totalorder %v654_v29, %v117_v34 }
  0xaa   :  { %vm98_vm1 = vmor %vm86_vm8, %vm94_vm9 }
  0xab   :  { %vm99_vm14 = vmor %vm87_vm11, %vm95_vm10  ;;  %v177_v42 = vpop.permute.xlu0 %176 }
  0xac   :  { %v682_v36 = vpop.permute.xlu1 %128  ;;  %vm100_vm4 = vmor %vm88_vm13, %vm96_vm2  ;;  %vm143_vm13 = vcmp.eq.s32.totalorder %v654_v29, %v141_v37 }
  0xad   :  { %vm686_vm6 = vmor %vm89_vm15, %vm97_vm12  ;;  %vm131_vm11 = vcmp.eq.s32.totalorder %v654_v29, %v682_v36  ;;  %vm109_vm12 = vcmp.eq.s32.totalorder %v662_v32, %v105_v35 }
  0xae   :  { %v757_v38 = vsel %vm686_vm6, 4294967295, %v756_v38  ;;  %vm692_vm8 = vmor %vm98_vm1, %vm106_vm0  ;;  %vm118_vm1 = vcmp.eq.s32.totalorder %v651_v26, %v117_v34  ;;  %vm121_vm6 = vcmp.eq.s32.totalorder %v662_v32, %v117_v34 }
  0xaf   :  { %v759_v39 = vsel %vm692_vm8, 4294967295, %v758_v39  ;;  %vm111_vm9 = vmor %vm99_vm14, %vm107_vm3 }
  0xb0   :  { %vm699_vm10 = vmor %vm100_vm4, %vm108_vm5  ;;  %vm762_vm14 = vnez %v759_v39  ;;  %vm179_vm5 = vcmp.eq.s32.totalorder %v654_v29, %v177_v42 }
  0xb1   :  { %v153_v40 = vpop.permute.xlu1 %152  ;;  %v761_v41 = vsel %vm699_vm10, 4294967295, %v760_v41  ;;  %vm123_vm15 = vmor %vm111_vm9, %vm119_vm7  ;;  %vm765_vm7 = vnez %v757_v38 }
  0xb2   :  { %vm155_vm2 = vcmp.eq.s32.totalorder %v654_v29, %v153_v40  ;;  %vm135_vm0 = vmor %vm123_vm15, %vm131_vm11  ;;  %vm133_vm15 = vcmp.eq.s32.totalorder %v662_v32, %v682_v36 }
  0xb3   :  { %vm147_vm8 = vmor %vm135_vm0, %vm143_vm13  ;;  %vm157_vm0 = vcmp.eq.s32.totalorder %v662_v32, %v153_v40 }
  0xb4   :  { %vm159_vm3 = vmor %vm147_vm8, %vm155_vm2  ;;  %vm120_vm8 = vcmp.eq.s32.totalorder %v657_v30, %v117_v34  ;;  %vm145_vm2 = vcmp.eq.s32.totalorder %v662_v32, %v141_v37 }
  0xb5   :  { %vm709_vm4 = vmor %vm762_vm14, %vm118_vm1 }
  0xb6   :  { %v764_v43 = vsel %vm709_vm4, 4294967295, %v763_v43  ;;  %v165_v44 = vpop.permute.xlu1 %164  ;;  %vm113_vm9 = vmor %vm765_vm7, %vm109_vm12  ;;  %vm766_vm12 = vnez %v761_v41 }
  0xb7   :  { %vm167_vm10 = vcmp.eq.s32.totalorder %v654_v29, %v165_v44  ;;  %vm125_vm11 = vmor %vm113_vm9, %vm121_vm6  ;;  %vm169_vm4 = vcmp.eq.s32.totalorder %v662_v32, %v165_v44  ;;  %vm142_vm9 = vcmp.eq.s32.totalorder %v651_v26, %v141_v37 }
  0xb8   :  { %vm171_vm13 = vmor %vm159_vm3, %vm167_vm10  ;;  %vm181_vm10 = vcmp.eq.s32.totalorder %v662_v32, %v177_v42  ;;  %vm130_vm3 = vcmp.eq.s32.totalorder %v651_v26, %v682_v36 }
  0xb9   :  { %vm183_vm1 = vmor %vm171_vm13, %vm179_vm5 }
  0xba   :  { %v423_v46 = vsel %vm183_vm1, 1.0, %v609_v45  ;;  %vm137_vm14 = vmor %vm125_vm11, %vm133_vm15  ;;  %vm154_vm15 = vcmp.eq.s32.totalorder %v651_v26, %v153_v40  ;;  %vm166_vm1 = vcmp.eq.s32.totalorder %v651_v26, %v165_v44 }
  0xbb   :  { %vm725_vm7 = vmor %vm766_vm12, %vm120_vm8  ;;  %329 = vmatprep.mubr.f32.mxu0 %v423_v46  ;;  %vm769_vm8 = vnez %v764_v43 }
  0xbc   :  { %v768_v47 = vsel %vm725_vm7, 4294967295, %v767_v47  ;;  %vm149_vm6 = vmor %vm137_vm14, %vm145_vm2  ;;  %vm178_vm2 = vcmp.eq.s32.totalorder %v651_v26, %v177_v42  ;;  %vm132_vm7 = vcmp.eq.s32.totalorder %v657_v30, %v682_v36 }
  0xbd   :  { %vm161_vm5 = vmor %vm149_vm6, %vm157_vm0  ;;  %vm144_vm6 = vcmp.eq.s32.totalorder %v657_v30, %v141_v37 }
  0xbe   :  { %vm173_vm13 = vmor %vm161_vm5, %vm169_vm4  ;;  %vm156_vm5 = vcmp.eq.s32.totalorder %v657_v30, %v153_v40 }
  0xbf   :  { %vm185_vm11 = vmor %vm173_vm13, %vm181_vm10  ;;  %vm168_vm13 = vcmp.eq.s32.totalorder %v657_v30, %v165_v44 }
  0xc0   :  { %v425_v48 = vsel %vm185_vm11, 1.0, %v609_v45  ;;  %vm134_vm12 = vmor %vm769_vm8, %vm130_vm3  ;;  %vm770_vm11 = vnez %v768_v47  ;;  %vm180_vm8 = vcmp.eq.s32.totalorder %v657_v30, %v177_v42 }
  0xc1   :  { %399 = vmatprep.mubr.f32.mxu1 %v425_v48  ;;  %vm146_vm14 = vmor %vm134_vm12, %vm142_vm9 }
  0xc2   :  { %vm158_vm0 = vmor %vm146_vm14, %vm154_vm15 }
  0xc3   :  { %vm170_vm4 = vmor %vm158_vm0, %vm166_vm1 }
  0xc4   :  { %vm182_vm10 = vmor %vm170_vm4, %vm178_vm2 }
  0xc5   :  { %v422_v49 = vsel %vm182_vm10, 1.0, %v609_v45  ;;  %vm136_vm3 = vmor %vm770_vm11, %vm132_vm7 }
  0xc6   :  { %330 = vmatmul.mubr.f32.vlgmr.msra.gmra.mxu0 %v422_v49  ;;  %vm148_vm9 = vmor %vm136_vm3, %vm144_vm6 }
  0xc7   :  { %vm160_vm12 = vmor %vm148_vm9, %vm156_vm5 }
  0xc8   :  { %vm172_vm14 = vmor %vm160_vm12, %vm168_vm13 }
  0xc9   :  { %vm184_vm15 = vmor %vm172_vm14, %vm180_vm8 }
  0xca   :  { %v424_v50 = vsel %vm184_vm15, 1.0, %v609_v45 }
  0xcb   :  { %400 = vmatmul.mubr.f32.vlgmr.msra.gmra.mxu1 %v424_v50 }
 0x186   :  { %v459_v51 = vpop.f32.mrf.mxu0 }
 0x188   :  { %v460_v52 = vpop.f32.mrf.mxu0 }
 0x189   :  { %v461_v54 = vadd.f32 %v460_v52, %v459_v51 }
 0x18b   :  { %v494_v55 = vpop.f32.mrf.mxu1  ;;  %v332_v56 = vadd.f32 %v461_v54, %v426_v53 }
 0x18d   :  { %v495_v57 = vpop.f32.mrf.mxu1 }
 0x18e   :  { %v496_v58 = vadd.f32 %v495_v57, %v494_v55 }
 0x190   :  { %v402_v59 = vadd.f32 %v496_v58, %v332_v56 }
 0x192   :  { %405 = vst [vmem:[#allocation7] sm:$0xff] %v402_v59 }
 0x193   :  { %578 = shalt.err (!%p575_p0)
}
 0x194   :  { %415 = dma.vmem_to_hbm [thread:$0]  %s413_s25, 128, %s755_s3, [#allocation4]  }
 0x195   :  { %591 = dma.done.wait [#allocation4], 128  }
 0x196   :  { %592 = vsyncadd [#allocation4], 4294967168 }
 0x197   :  { %419 = vsyncpa [#allocation3], 1 }
 0x198   :  { %420 = vsyncpa [#allocation6], 1 }
 0x199   :  { %421 = vsyncpa [#allocation4], 1 }

</bundles_post_ra>
